<compile_context>
chip_gen: v7x
topology: tpu7x:2x2x1
jax: 0.10.0
libtpu: 0.0.40
codegen_flags: <defaults>
</compile_context>

<pallas_src>
import jax
import jax.numpy as jnp
from jax.experimental import pallas as pl
from jax.experimental.pallas import tpu as pltpu

NEG_MASK = -1e30  # bias for padded vocab lanes (exp underflows to exactly 0)


# ---------------------------------------------------------------------------
# Kernel factory
# ---------------------------------------------------------------------------
def _make_kernel(layout):
    H, O, L, OP = layout["H"], layout["O"], layout["L"], layout["OP"]
    offs = layout["offsets"]
    f32 = jnp.float32

    def kernel(x_ref, h0_ref, enc_ref, w_ref, b_ref, out_ref, hid_ref, h_sc):
        t = pl.program_id(0)

        @pl.when(t == 0)
        def _init():
            h_sc[...] = h0_ref[...]          # hidden carry lives in VMEM scratch

        x = x_ref[...]                       # (B, O)   f32, this step's input
        h = h_sc[...]                        # (B, H)   f32, carried hidden
        b = b_ref[...]                       # (8, 128) f32, all biases

        def mm(a, name):
            off, rows = offs[name]           # static row slice of bf16 slab
            return jnp.dot(a, w_ref[off:off + rows, :],
                           preferred_element_type=f32)

        # embedded = relu(embedding(input))
        emb = jnp.maximum(mm(x, "w_emb")[:, :H] + b[0:1, :H], 0.0)

        # attn_weights = softmax(attn(cat(embedded, hidden)))
        # split matmuls: the hidden half depends only on an input.
        logits = (mm(h, "w_attn_h") + mm(emb, "w_attn_e") + b[1:2, :])[:, :L]
        m = jnp.max(logits, axis=-1, keepdims=True)
        e = jnp.exp(logits - m)
        attn_w = e * pl.reciprocal(jnp.sum(e, axis=-1, keepdims=True),
                                   approx=False)                    # (B, L)

        # context = bmm(attn_w.unsqueeze(1), enc.transpose(0,1)).squeeze(1)
        # computed as L lane-broadcast FMAs on the native (L, B, H) layout.
        ctx = attn_w[:, 0:1] * enc_ref[0]
        for l in range(1, L):
            ctx = ctx + attn_w[:, l:l + 1] * enc_ref[l]              # (B, H)

        # rnn_input = attn_combine(cat(embedded, context)) -- kept fused
        rnn_in = (mm(jnp.concatenate([emb, ctx], axis=-1), "w_comb")[:, :H]
                  + b[2:3, :H])

        # single-step GRU; gates at compact stride (r|z|n at lanes 0/H/2H)
        gi = mm(rnn_in, "w_ih")[:, :3 * H] + b[4:5, :3 * H]
        gh = mm(h, "w_hh")[:, :3 * H] + b[5:6, :3 * H]
        r = jax.nn.sigmoid(gi[:, 0:H] + gh[:, 0:H])
        z = jax.nn.sigmoid(gi[:, H:2 * H] + gh[:, H:2 * H])
        n = jnp.tanh(gi[:, 2 * H:3 * H] + r * gh[:, 2 * H:3 * H])
        h_new = (1.0 - z) * n + z * h

        # output = log_softmax(out(cat(gru_output, context)))
        # split matmuls: the ctx half overlaps the GRU gate matmuls.
        o_logits = mm(ctx, "w_out_c") + mm(h_new, "w_out_h") + b[3:4, :]
        mo = jnp.max(o_logits, axis=-1, keepdims=True)
        lse = jnp.log(jnp.sum(jnp.exp(o_logits - mo), axis=-1,
                              keepdims=True)) + mo
        out_ref[...] = o_logits - lse                                # (B, OP)

        h_sc[...] = h_new
        hid_ref[...] = h_new

    return kernel


# ---------------------------------------------------------------------------
# Parameter packing: logical params -> one bf16 weight slab + one f32 bias slab
# ---------------------------------------------------------------------------
def pack_params(p, hidden_size, output_size, output_len):
    H, O, L = hidden_size, output_size, output_len
    WL = 128                       # single-vreg lane width for every block
    OP = WL                        # padded vocab lane width

    assert O % 16 == 0 and H % 16 == 0, "packer assumes 16-row-aligned blocks"
    assert max(3 * H, O, L) <= WL, "compact layout needs 3H, O, L <= 128"

    def rows16(n):
        return ((n + 15) // 16) * 16

    blocks = [
        ("w_emb",    p["w_emb"]),        # (O, H)
        ("w_attn_e", p["w_attn"][:H]),   # (H, L)  embedded half of attn
        ("w_attn_h", p["w_attn"][H:]),   # (H, L)  hidden half of attn
        ("w_comb",   p["w_comb"]),       # (2H, H) fused attn_combine
        ("w_out_h",  p["w_out"][:H]),    # (H, O)  gru-output half of out
        ("w_out_c",  p["w_out"][H:]),    # (H, O)  context half of out
        ("w_ih",     p["w_ih"]),         # (H, 3H) compact gate stride (GW=H)
        ("w_hh",     p["w_hh"]),         # (H, 3H)
    ]
    offsets, row, padded = {}, 0, []
    for name, w in blocks:
        r_log = w.shape[0]
        r_pad = rows16(r_log)
        blk = jnp.zeros((r_pad, WL), jnp.float32).at[:r_log, :w.shape[1]].set(w)
        offsets[name] = (row, r_log)
        row += r_pad
        padded.append(blk)
    w_slab = jnp.concatenate(padded, axis=0).astype(jnp.bfloat16)  # (272,128)

    b = jnp.zeros((8, WL), jnp.float32)
    b = b.at[0, :H].set(p["b_emb"][0])
    b = b.at[1, :L].set(p["b_attn"][0])
    b = b.at[2, :H].set(p["b_comb"][0])
    b = b.at[3, :].set(NEG_MASK)               # mask the padded vocab lanes
    b = b.at[3, :O].set(p["b_out"][0])
    b = b.at[4, :3 * H].set(p["b_ih"][0])      # compact gate-stride biases
    b = b.at[5, :3 * H].set(p["b_hh"][0])

    layout = dict(H=H, O=O, L=L, OP=OP, WL=WL, rows=row, offsets=offsets)
    return {"w": w_slab, "b": b, "layout": layout}


# ---------------------------------------------------------------------------
# Wrapper: T decode steps in ONE pallas_call (T=1 == the module's forward)
# ---------------------------------------------------------------------------
def attn_decoder_forward(packed, inputs, hidden, encoder_outputs):
    """inputs (T, B, O); hidden (1, B, H); encoder_outputs (L, B, H).
    Returns (log_probs (T, B, O), final hidden (1, B, H))."""
    lay = packed["layout"]
    H, O, L, OP = lay["H"], lay["O"], lay["L"], lay["OP"]
    WL, R = lay["WL"], lay["rows"]
    T, B, _ = inputs.shape
    f32 = jnp.float32

    out_p, hid = pl.pallas_call(
        _make_kernel(lay),
        grid=(T,),
        in_specs=[
            pl.BlockSpec((None, B, O), lambda t: (t, 0, 0)),   # x_t streamed
            pl.BlockSpec((B, H), lambda t: (0, 0)),            # h0 (loaded once)
            pl.BlockSpec((L, B, H), lambda t: (0, 0, 0)),      # enc (VMEM-resident)
            pl.BlockSpec((R, WL), lambda t: (0, 0)),           # weight slab (resident)
            pl.BlockSpec((8, WL), lambda t: (0, 0)),           # bias slab (resident)
        ],
        out_specs=(
            pl.BlockSpec((None, B, OP), lambda t: (t, 0, 0)),  # per-step log-probs
            pl.BlockSpec((B, H), lambda t: (0, 0)),            # final hidden
        ),
        out_shape=(jax.ShapeDtypeStruct((T, B, OP), f32),
                   jax.ShapeDtypeStruct((B, H), f32)),
        scratch_shapes=[pltpu.VMEM((B, H), f32)],              # hidden carry
        compiler_params=pltpu.CompilerParams(
            dimension_semantics=("arbitrary",)),
    )(inputs.astype(f32), hidden[0].astype(f32),
      encoder_outputs.astype(f32), packed["w"], packed["b"])

    return out_p[..., :O], hid[None]


# ---------------------------------------------------------------------------
# Logical (PyTorch-equivalent, pre-transposed) parameters
# ---------------------------------------------------------------------------
def init_params(key, hidden_size, output_size, output_len):
    H, O, L = hidden_size, output_size, output_len
    ks = jax.random.split(key, 12)

    def u(k, shape, scale=0.2):
        return jax.random.uniform(k, shape, jnp.float32, -scale, scale)

    p = {}
    p["w_emb"] = u(ks[0], (O, H));        p["b_emb"] = u(ks[1], (1, H))
    p["w_attn"] = u(ks[2], (2 * H, L));   p["b_attn"] = u(ks[3], (1, L))
    p["w_comb"] = u(ks[4], (2 * H, H));   p["b_comb"] = u(ks[5], (1, H))
    p["w_ih"] = u(ks[6], (H, 3 * H));     p["w_hh"] = u(ks[7], (H, 3 * H))
    p["b_ih"] = u(ks[8], (1, 3 * H));     p["b_hh"] = u(ks[9], (1, 3 * H))
    p["w_out"] = u(ks[10], (2 * H, O));   p["b_out"] = u(ks[11], (1, O))
    return p


def reference_forward(p, inp, hidden, encoder_outputs):
    """Pure-JAX single-step reference (same semantics as the PyTorch forward);
    weights go through the same bf16 storage rounding as the packed slab."""
    f32, bf16 = jnp.float32, jnp.bfloat16
    q = lambda w: w.astype(bf16).astype(f32)
    h = hidden[0]
    H = h.shape[-1]
    emb = jax.nn.relu(inp @ q(p["w_emb"]) + p["b_emb"])
    logits = jnp.concatenate([emb, h], -1) @ q(p["w_attn"]) + p["b_attn"]
    attn_w = jax.nn.softmax(logits, axis=-1)
    ctx = jnp.einsum("bl,lbh->bh", attn_w, encoder_outputs)
    rnn_in = jnp.concatenate([emb, ctx], -1) @ q(p["w_comb"]) + p["b_comb"]
    gi = rnn_in @ q(p["w_ih"]) + p["b_ih"]
    gh = h @ q(p["w_hh"]) + p["b_hh"]
    r = jax.nn.sigmoid(gi[:, :H] + gh[:, :H])
    z = jax.nn.sigmoid(gi[:, H:2 * H] + gh[:, H:2 * H])
    n = jnp.tanh(gi[:, 2 * H:] + r * gh[:, 2 * H:])
    h_new = (1.0 - z) * n + z * h
    o = jnp.concatenate([h_new, ctx], -1) @ q(p["w_out"]) + p["b_out"]
    return jax.nn.log_softmax(o, axis=-1), h_new[None]


if __name__ == "__main__":
    # Small shapes implied by the module: batch=4, hidden=32, output_size=16,
    # args.output_len (encoder sequence length) = 8, n_layers = 1, T=6 steps.
    B, H, OUT_SIZE, OUT_LEN, T = 4, 32, 16, 8, 6

    key = jax.random.PRNGKey(0)
    kp, kx, kh, ke = jax.random.split(key, 4)
    params = init_params(kp, H, OUT_SIZE, OUT_LEN)
    packed = pack_params(params, H, OUT_SIZE, OUT_LEN)

    x_seq = jax.random.normal(kx, (T, B, OUT_SIZE), jnp.float32)      # per-step inputs
    hidden0 = jax.random.normal(kh, (1, B, H), jnp.float32)           # (n_layers, B, H)
    enc = jax.random.normal(ke, (OUT_LEN, B, H), jnp.float32)         # (L, B, H)

    # Single-step call (module-exact) and fused multi-step decode.
    out1, h1 = attn_decoder_forward(packed, x_seq[:1], hidden0, enc)
    out_seq, h_fin = attn_decoder_forward(packed, x_seq, hidden0, enc)
    jax.block_until_ready((out1, h1, out_seq, h_fin))

    # Pure-JAX references.
    ref1, ref_h1 = reference_forward(params, x_seq[0], hidden0, enc)
    h = hidden0
    ref_outs = []
    for t in range(T):
        o, h = reference_forward(params, x_seq[t], h, enc)
        ref_outs.append(o)
    ref_seq = jnp.stack(ref_outs)

    assert jnp.allclose(out1[0], ref1, atol=1e-4, rtol=1e-4), "step-0 output mismatch"
    assert jnp.allclose(h1, ref_h1, atol=1e-4, rtol=1e-4), "step-0 hidden mismatch"
    assert jnp.allclose(out_seq, ref_seq, atol=1e-4, rtol=1e-4), "sequence output mismatch"
    assert jnp.allclose(h_fin, h, atol=1e-4, rtol=1e-4), "final hidden mismatch"

    # TODO(synk): the in-forward print() of tensor sizes is a host-side debug
    # side effect and is intentionally omitted.
    print("KERNEL_OK")
</pallas_src>

<mosaic_0001>
module attributes {stable_mosaic.version = 11 : i64} {
  func.func @kernel(%arg0: i32, %arg1: memref<1x4x16xf32, #tpu.memory_space<vmem>>, %arg2: memref<4x32xf32, #tpu.memory_space<vmem>>, %arg3: memref<8x4x32xf32, #tpu.memory_space<vmem>>, %arg4: memref<272x128xbf16, #tpu.memory_space<vmem>>, %arg5: memref<8x128xf32, #tpu.memory_space<vmem>>, %arg6: memref<1x4x128xf32, #tpu.memory_space<vmem>>, %arg7: memref<4x32xf32, #tpu.memory_space<vmem>>, %arg8: memref<4x32xf32, #tpu.memory_space<vmem>>) attributes {dimension_semantics = [#tpu.dimension_semantics<arbitrary>], iteration_bounds = array<i64: 1>, scalar_prefetch = 0 : i64, scratch_operands = 1 : i64, tpu.core_type = #tpu.core_type<tc>, window_params = [{transform_indices = @transform_0, window_bounds = array<i64: 1, 4, 16>}, {pipeline_mode = #tpu.pipeline_mode<synchronous>, transform_indices = @transform_1, window_bounds = array<i64: 4, 32>}, {pipeline_mode = #tpu.pipeline_mode<synchronous>, transform_indices = @transform_2, window_bounds = array<i64: 8, 4, 32>}, {pipeline_mode = #tpu.pipeline_mode<synchronous>, transform_indices = @transform_3, window_bounds = array<i64: 272, 128>}, {pipeline_mode = #tpu.pipeline_mode<synchronous>, transform_indices = @transform_4, window_bounds = array<i64: 8, 128>}, {transform_indices = @transform_5, window_bounds = array<i64: 1, 4, 128>}, {pipeline_mode = #tpu.pipeline_mode<synchronous>, transform_indices = @transform_6, window_bounds = array<i64: 4, 32>}]} {
    %c0_i32 = arith.constant 0 : i32
    %0 = arith.cmpi eq, %arg0, %c0_i32 : i32
    %1 = arith.extui %0 : i1 to i32
    %c0_i32_0 = arith.constant 0 : i32
    %2 = arith.cmpi ne, %1, %c0_i32_0 : i32
    scf.if %2 {
      %c0_55 = arith.constant 0 : index
      %c0_56 = arith.constant 0 : index
      %150 = vector.load %arg2[%c0_55, %c0_56] : memref<4x32xf32, #tpu.memory_space<vmem>>, vector<4x32xf32>
      %c0_57 = arith.constant 0 : index
      %c0_58 = arith.constant 0 : index
      %151 = vector.load %arg8[%c0_57, %c0_58] : memref<4x32xf32, #tpu.memory_space<vmem>>, vector<4x32xf32>
      tpu.vector_store %arg8[%c0_57, %c0_58], %150 {strides = array<i32>} : memref<4x32xf32, #tpu.memory_space<vmem>>, vector<4x32xf32>,
    } else {
    }
    %c0 = arith.constant 0 : index
    %c0_1 = arith.constant 0 : index
    %c0_2 = arith.constant 0 : index
    %3 = vector.load %arg1[%c0, %c0_1, %c0_2] : memref<1x4x16xf32, #tpu.memory_space<vmem>>, vector<1x4x16xf32>
    %4 = vector.shape_cast %3 : vector<1x4x16xf32> to vector<4x16xf32>
    %c0_3 = arith.constant 0 : index
    %c0_4 = arith.constant 0 : index
    %5 = vector.load %arg8[%c0_3, %c0_4] : memref<4x32xf32, #tpu.memory_space<vmem>>, vector<4x32xf32>
    %c0_5 = arith.constant 0 : index
    %c0_6 = arith.constant 0 : index
    %6 = vector.load %arg5[%c0_5, %c0_6] : memref<8x128xf32, #tpu.memory_space<vmem>>, vector<8x128xf32>
    %c0_7 = arith.constant 0 : index
    %c0_8 = arith.constant 0 : index
    %7 = vector.load %arg4[%c0_7, %c0_8] : memref<272x128xbf16, #tpu.memory_space<vmem>>, vector<16x128xbf16>
    %cst = arith.constant dense<0.000000e+00> : vector<4x128xf32>
    %8 = tpu.matmul %4, %7, %cst {dimension_numbers = #tpu.dot_dimension_numbers<[1], [0], [0], [1], [0, 0, 1, 1], [], []>} : vector<4x16xf32>, vector<16x128xbf16>, vector<4x128xf32> -> vector<4x128xf32>
    %9 = vector.extract_strided_slice %8 {offsets = [0, 0], sizes = [4, 32], strides = [1, 1]} : vector<4x128xf32> to vector<4x32xf32>
    %10 = vector.extract_strided_slice %6 {offsets = [0, 0], sizes = [1, 32], strides = [1, 1]} : vector<8x128xf32> to vector<1x32xf32>
    %11 = vector.broadcast %10 : vector<1x32xf32> to vector<4x32xf32>
    %12 = arith.addf %9, %11 : vector<4x32xf32>
    %cst_9 = arith.constant 0.000000e+00 : f32
    %13 = vector.broadcast %cst_9 : f32 to vector<4x32xf32>
    %14 = arith.maximumf %12, %13 : vector<4x32xf32>
    %c48 = arith.constant 48 : index
    %c0_10 = arith.constant 0 : index
    %15 = vector.load %arg4[%c48, %c0_10] : memref<272x128xbf16, #tpu.memory_space<vmem>>, vector<32x128xbf16>
    %cst_11 = arith.constant dense<0.000000e+00> : vector<4x128xf32>
    %16 = tpu.matmul %5, %15, %cst_11 {dimension_numbers = #tpu.dot_dimension_numbers<[1], [0], [0], [1], [0, 0, 1, 1], [], []>} : vector<4x32xf32>, vector<32x128xbf16>, vector<4x128xf32> -> vector<4x128xf32>
    %c16 = arith.constant 16 : index
    %c0_12 = arith.constant 0 : index
    %17 = vector.load %arg4[%c16, %c0_12] : memref<272x128xbf16, #tpu.memory_space<vmem>>, vector<32x128xbf16>
    %cst_13 = arith.constant dense<0.000000e+00> : vector<4x128xf32>
    %18 = tpu.matmul %14, %17, %cst_13 {dimension_numbers = #tpu.dot_dimension_numbers<[1], [0], [0], [1], [0, 0, 1, 1], [], []>} : vector<4x32xf32>, vector<32x128xbf16>, vector<4x128xf32> -> vector<4x128xf32>
    %19 = arith.addf %16, %18 : vector<4x128xf32>
    %20 = vector.extract_strided_slice %6 {offsets = [1, 0], sizes = [1, 128], strides = [1, 1]} : vector<8x128xf32> to vector<1x128xf32>
    %21 = vector.broadcast %20 : vector<1x128xf32> to vector<4x128xf32>
    %22 = arith.addf %19, %21 : vector<4x128xf32>
    %23 = vector.extract_strided_slice %22 {offsets = [0, 0], sizes = [4, 8], strides = [1, 1]} : vector<4x128xf32> to vector<4x8xf32>
    %cst_14 = arith.constant dense<0xFF800000> : vector<4xf32>
    %24 = vector.multi_reduction <maximumf>, %23, %cst_14 [1] : vector<4x8xf32> to vector<4xf32>
    %25 = vector.shape_cast %24 : vector<4xf32> to vector<4x1xf32>
    %26 = vector.broadcast %25 : vector<4x1xf32> to vector<4x8xf32>
    %27 = arith.subf %23, %26 : vector<4x8xf32>
    %28 = math.exp %27 : vector<4x8xf32>
    %cst_15 = arith.constant dense<0.000000e+00> : vector<4xf32>
    %29 = vector.multi_reduction <add>, %28, %cst_15 [1] : vector<4x8xf32> to vector<4xf32>
    %30 = vector.shape_cast %29 : vector<4xf32> to vector<4x1xf32>
    %31 = tpu.reciprocal %30 : vector<4x1xf32> -> vector<4x1xf32>
    %32 = vector.broadcast %31 : vector<4x1xf32> to vector<4x8xf32>
    %33 = arith.mulf %28, %32 : vector<4x8xf32>
    %34 = vector.extract_strided_slice %33 {offsets = [0, 0], sizes = [4, 1], strides = [1, 1]} : vector<4x8xf32> to vector<4x1xf32>
    %c0_16 = arith.constant 0 : index
    %c0_17 = arith.constant 0 : index
    %c0_18 = arith.constant 0 : index
    %35 = vector.load %arg3[%c0_16, %c0_17, %c0_18] : memref<8x4x32xf32, #tpu.memory_space<vmem>>, vector<1x4x32xf32>
    %36 = vector.shape_cast %35 : vector<1x4x32xf32> to vector<4x32xf32>
    %37 = vector.broadcast %34 : vector<4x1xf32> to vector<4x32xf32>
    %38 = arith.mulf %37, %36 : vector<4x32xf32>
    %39 = vector.extract_strided_slice %33 {offsets = [0, 1], sizes = [4, 1], strides = [1, 1]} : vector<4x8xf32> to vector<4x1xf32>
    %c1 = arith.constant 1 : index
    %c0_19 = arith.constant 0 : index
    %c0_20 = arith.constant 0 : index
    %40 = vector.load %arg3[%c1, %c0_19, %c0_20] : memref<8x4x32xf32, #tpu.memory_space<vmem>>, vector<1x4x32xf32>
    %41 = vector.shape_cast %40 : vector<1x4x32xf32> to vector<4x32xf32>
    %42 = vector.broadcast %39 : vector<4x1xf32> to vector<4x32xf32>
    %43 = arith.mulf %42, %41 : vector<4x32xf32>
    %44 = arith.addf %38, %43 : vector<4x32xf32>
    %45 = vector.extract_strided_slice %33 {offsets = [0, 2], sizes = [4, 1], strides = [1, 1]} : vector<4x8xf32> to vector<4x1xf32>
    %c2 = arith.constant 2 : index
    %c0_21 = arith.constant 0 : index
    %c0_22 = arith.constant 0 : index
    %46 = vector.load %arg3[%c2, %c0_21, %c0_22] : memref<8x4x32xf32, #tpu.memory_space<vmem>>, vector<1x4x32xf32>
    %47 = vector.shape_cast %46 : vector<1x4x32xf32> to vector<4x32xf32>
    %48 = vector.broadcast %45 : vector<4x1xf32> to vector<4x32xf32>
    %49 = arith.mulf %48, %47 : vector<4x32xf32>
    %50 = arith.addf %44, %49 : vector<4x32xf32>
    %51 = vector.extract_strided_slice %33 {offsets = [0, 3], sizes = [4, 1], strides = [1, 1]} : vector<4x8xf32> to vector<4x1xf32>
    %c3 = arith.constant 3 : index
    %c0_23 = arith.constant 0 : index
    %c0_24 = arith.constant 0 : index
    %52 = vector.load %arg3[%c3, %c0_23, %c0_24] : memref<8x4x32xf32, #tpu.memory_space<vmem>>, vector<1x4x32xf32>
    %53 = vector.shape_cast %52 : vector<1x4x32xf32> to vector<4x32xf32>
    %54 = vector.broadcast %51 : vector<4x1xf32> to vector<4x32xf32>
    %55 = arith.mulf %54, %53 : vector<4x32xf32>
    %56 = arith.addf %50, %55 : vector<4x32xf32>
    %57 = vector.extract_strided_slice %33 {offsets = [0, 4], sizes = [4, 1], strides = [1, 1]} : vector<4x8xf32> to vector<4x1xf32>
    %c4 = arith.constant 4 : index
    %c0_25 = arith.constant 0 : index
    %c0_26 = arith.constant 0 : index
    %58 = vector.load %arg3[%c4, %c0_25, %c0_26] : memref<8x4x32xf32, #tpu.memory_space<vmem>>, vector<1x4x32xf32>
    %59 = vector.shape_cast %58 : vector<1x4x32xf32> to vector<4x32xf32>
    %60 = vector.broadcast %57 : vector<4x1xf32> to vector<4x32xf32>
    %61 = arith.mulf %60, %59 : vector<4x32xf32>
    %62 = arith.addf %56, %61 : vector<4x32xf32>
    %63 = vector.extract_strided_slice %33 {offsets = [0, 5], sizes = [4, 1], strides = [1, 1]} : vector<4x8xf32> to vector<4x1xf32>
    %c5 = arith.constant 5 : index
    %c0_27 = arith.constant 0 : index
    %c0_28 = arith.constant 0 : index
    %64 = vector.load %arg3[%c5, %c0_27, %c0_28] : memref<8x4x32xf32, #tpu.memory_space<vmem>>, vector<1x4x32xf32>
    %65 = vector.shape_cast %64 : vector<1x4x32xf32> to vector<4x32xf32>
    %66 = vector.broadcast %63 : vector<4x1xf32> to vector<4x32xf32>
    %67 = arith.mulf %66, %65 : vector<4x32xf32>
    %68 = arith.addf %62, %67 : vector<4x32xf32>
    %69 = vector.extract_strided_slice %33 {offsets = [0, 6], sizes = [4, 1], strides = [1, 1]} : vector<4x8xf32> to vector<4x1xf32>
    %c6 = arith.constant 6 : index
    %c0_29 = arith.constant 0 : index
    %c0_30 = arith.constant 0 : index
    %70 = vector.load %arg3[%c6, %c0_29, %c0_30] : memref<8x4x32xf32, #tpu.memory_space<vmem>>, vector<1x4x32xf32>
    %71 = vector.shape_cast %70 : vector<1x4x32xf32> to vector<4x32xf32>
    %72 = vector.broadcast %69 : vector<4x1xf32> to vector<4x32xf32>
    %73 = arith.mulf %72, %71 : vector<4x32xf32>
    %74 = arith.addf %68, %73 : vector<4x32xf32>
    %75 = vector.extract_strided_slice %33 {offsets = [0, 7], sizes = [4, 1], strides = [1, 1]} : vector<4x8xf32> to vector<4x1xf32>
    %c7 = arith.constant 7 : index
    %c0_31 = arith.constant 0 : index
    %c0_32 = arith.constant 0 : index
    %76 = vector.load %arg3[%c7, %c0_31, %c0_32] : memref<8x4x32xf32, #tpu.memory_space<vmem>>, vector<1x4x32xf32>
    %77 = vector.shape_cast %76 : vector<1x4x32xf32> to vector<4x32xf32>
    %78 = vector.broadcast %75 : vector<4x1xf32> to vector<4x32xf32>
    %79 = arith.mulf %78, %77 : vector<4x32xf32>
    %80 = arith.addf %74, %79 : vector<4x32xf32>
    %81 = tpu.concatenate %14, %80 in 1 : vector<4x32xf32>, vector<4x32xf32> -> vector<4x64xf32>
    %c80 = arith.constant 80 : index
    %c0_33 = arith.constant 0 : index
    %82 = vector.load %arg4[%c80, %c0_33] : memref<272x128xbf16, #tpu.memory_space<vmem>>, vector<64x128xbf16>
    %cst_34 = arith.constant dense<0.000000e+00> : vector<4x128xf32>
    %83 = tpu.matmul %81, %82, %cst_34 {dimension_numbers = #tpu.dot_dimension_numbers<[1], [0], [0], [1], [0, 0, 1, 1], [], []>} : vector<4x64xf32>, vector<64x128xbf16>, vector<4x128xf32> -> vector<4x128xf32>
    %84 = vector.extract_strided_slice %83 {offsets = [0, 0], sizes = [4, 32], strides = [1, 1]} : vector<4x128xf32> to vector<4x32xf32>
    %85 = vector.extract_strided_slice %6 {offsets = [2, 0], sizes = [1, 32], strides = [1, 1]} : vector<8x128xf32> to vector<1x32xf32>
    %86 = vector.broadcast %85 : vector<1x32xf32> to vector<4x32xf32>
    %87 = arith.addf %84, %86 : vector<4x32xf32>
    %c208 = arith.constant 208 : index
    %c0_35 = arith.constant 0 : index
    %88 = vector.load %arg4[%c208, %c0_35] : memref<272x128xbf16, #tpu.memory_space<vmem>>, vector<32x128xbf16>
    %cst_36 = arith.constant dense<0.000000e+00> : vector<4x128xf32>
    %89 = tpu.matmul %87, %88, %cst_36 {dimension_numbers = #tpu.dot_dimension_numbers<[1], [0], [0], [1], [0, 0, 1, 1], [], []>} : vector<4x32xf32>, vector<32x128xbf16>, vector<4x128xf32> -> vector<4x128xf32>
    %90 = vector.extract_strided_slice %89 {offsets = [0, 0], sizes = [4, 96], strides = [1, 1]} : vector<4x128xf32> to vector<4x96xf32>
    %91 = vector.extract_strided_slice %6 {offsets = [4, 0], sizes = [1, 96], strides = [1, 1]} : vector<8x128xf32> to vector<1x96xf32>
    %92 = vector.broadcast %91 : vector<1x96xf32> to vector<4x96xf32>
    %93 = arith.addf %90, %92 : vector<4x96xf32>
    %c240 = arith.constant 240 : index
    %c0_37 = arith.constant 0 : index
    %94 = vector.load %arg4[%c240, %c0_37] : memref<272x128xbf16, #tpu.memory_space<vmem>>, vector<32x128xbf16>
    %cst_38 = arith.constant dense<0.000000e+00> : vector<4x128xf32>
    %95 = tpu.matmul %5, %94, %cst_38 {dimension_numbers = #tpu.dot_dimension_numbers<[1], [0], [0], [1], [0, 0, 1, 1], [], []>} : vector<4x32xf32>, vector<32x128xbf16>, vector<4x128xf32> -> vector<4x128xf32>
    %96 = vector.extract_strided_slice %95 {offsets = [0, 0], sizes = [4, 96], strides = [1, 1]} : vector<4x128xf32> to vector<4x96xf32>
    %97 = vector.extract_strided_slice %6 {offsets = [5, 0], sizes = [1, 96], strides = [1, 1]} : vector<8x128xf32> to vector<1x96xf32>
    %98 = vector.broadcast %97 : vector<1x96xf32> to vector<4x96xf32>
    %99 = arith.addf %96, %98 : vector<4x96xf32>
    %100 = vector.extract_strided_slice %93 {offsets = [0, 0], sizes = [4, 32], strides = [1, 1]} : vector<4x96xf32> to vector<4x32xf32>
    %101 = vector.extract_strided_slice %99 {offsets = [0, 0], sizes = [4, 32], strides = [1, 1]} : vector<4x96xf32> to vector<4x32xf32>
    %102 = arith.addf %100, %101 : vector<4x32xf32>
    %103 = arith.negf %102 : vector<4x32xf32>
    %104 = math.exp %103 : vector<4x32xf32>
    %cst_39 = arith.constant 1.000000e+00 : f32
    %105 = vector.broadcast %cst_39 : f32 to vector<4x32xf32>
    %106 = arith.addf %105, %104 : vector<4x32xf32>
    %107 = arith.divf %105, %106 : vector<4x32xf32>
    %108 = vector.extract_strided_slice %93 {offsets = [0, 32], sizes = [4, 32], strides = [1, 1]} : vector<4x96xf32> to vector<4x32xf32>
    %109 = vector.extract_strided_slice %99 {offsets = [0, 32], sizes = [4, 32], strides = [1, 1]} : vector<4x96xf32> to vector<4x32xf32>
    %110 = arith.addf %108, %109 : vector<4x32xf32>
    %111 = arith.negf %110 : vector<4x32xf32>
    %112 = math.exp %111 : vector<4x32xf32>
    %cst_40 = arith.constant 1.000000e+00 : f32
    %113 = vector.broadcast %cst_40 : f32 to vector<4x32xf32>
    %114 = arith.addf %113, %112 : vector<4x32xf32>
    %115 = arith.divf %113, %114 : vector<4x32xf32>
    %116 = vector.extract_strided_slice %93 {offsets = [0, 64], sizes = [4, 32], strides = [1, 1]} : vector<4x96xf32> to vector<4x32xf32>
    %117 = vector.extract_strided_slice %99 {offsets = [0, 64], sizes = [4, 32], strides = [1, 1]} : vector<4x96xf32> to vector<4x32xf32>
    %118 = arith.mulf %107, %117 : vector<4x32xf32>
    %119 = arith.addf %116, %118 : vector<4x32xf32>
    %120 = math.tanh %119 : vector<4x32xf32>
    %cst_41 = arith.constant 1.000000e+00 : f32
    %121 = vector.broadcast %cst_41 : f32 to vector<4x32xf32>
    %122 = arith.subf %121, %115 : vector<4x32xf32>
    %123 = arith.mulf %122, %120 : vector<4x32xf32>
    %124 = arith.mulf %115, %5 : vector<4x32xf32>
    %125 = arith.addf %123, %124 : vector<4x32xf32>
    %c176 = arith.constant 176 : index
    %c0_42 = arith.constant 0 : index
    %126 = vector.load %arg4[%c176, %c0_42] : memref<272x128xbf16, #tpu.memory_space<vmem>>, vector<32x128xbf16>
    %cst_43 = arith.constant dense<0.000000e+00> : vector<4x128xf32>
    %127 = tpu.matmul %80, %126, %cst_43 {dimension_numbers = #tpu.dot_dimension_numbers<[1], [0], [0], [1], [0, 0, 1, 1], [], []>} : vector<4x32xf32>, vector<32x128xbf16>, vector<4x128xf32> -> vector<4x128xf32>
    %c144 = arith.constant 144 : index
    %c0_44 = arith.constant 0 : index
    %128 = vector.load %arg4[%c144, %c0_44] : memref<272x128xbf16, #tpu.memory_space<vmem>>, vector<32x128xbf16>
    %cst_45 = arith.constant dense<0.000000e+00> : vector<4x128xf32>
    %129 = tpu.matmul %125, %128, %cst_45 {dimension_numbers = #tpu.dot_dimension_numbers<[1], [0], [0], [1], [0, 0, 1, 1], [], []>} : vector<4x32xf32>, vector<32x128xbf16>, vector<4x128xf32> -> vector<4x128xf32>
    %130 = arith.addf %127, %129 : vector<4x128xf32>
    %131 = vector.extract_strided_slice %6 {offsets = [3, 0], sizes = [1, 128], strides = [1, 1]} : vector<8x128xf32> to vector<1x128xf32>
    %132 = vector.broadcast %131 : vector<1x128xf32> to vector<4x128xf32>
    %133 = arith.addf %130, %132 : vector<4x128xf32>
    %cst_46 = arith.constant dense<0xFF800000> : vector<4xf32>
    %134 = vector.multi_reduction <maximumf>, %133, %cst_46 [1] : vector<4x128xf32> to vector<4xf32>
    %135 = vector.shape_cast %134 : vector<4xf32> to vector<4x1xf32>
    %136 = vector.broadcast %135 : vector<4x1xf32> to vector<4x128xf32>
    %137 = arith.subf %133, %136 : vector<4x128xf32>
    %138 = math.exp %137 : vector<4x128xf32>
    %cst_47 = arith.constant dense<0.000000e+00> : vector<4xf32>
    %139 = vector.multi_reduction <add>, %138, %cst_47 [1] : vector<4x128xf32> to vector<4xf32>
    %140 = vector.shape_cast %139 : vector<4xf32> to vector<4x1xf32>
    %141 = math.log %140 : vector<4x1xf32>
    %142 = arith.addf %141, %135 : vector<4x1xf32>
    %143 = vector.broadcast %142 : vector<4x1xf32> to vector<4x128xf32>
    %144 = arith.subf %133, %143 : vector<4x128xf32>
    %c0_48 = arith.constant 0 : index
    %c0_49 = arith.constant 0 : index
    %c0_50 = arith.constant 0 : index
    %145 = vector.load %arg6[%c0_48, %c0_49, %c0_50] : memref<1x4x128xf32, #tpu.memory_space<vmem>>, vector<1x4x128xf32>
    %146 = vector.shape_cast %145 : vector<1x4x128xf32> to vector<4x128xf32>
    %147 = vector.shape_cast %144 : vector<4x128xf32> to vector<1x4x128xf32>
    tpu.vector_store %arg6[%c0_48, %c0_49, %c0_50], %147 {strides = array<i32>} : memref<1x4x128xf32, #tpu.memory_space<vmem>>, vector<1x4x128xf32>,
    %c0_51 = arith.constant 0 : index
    %c0_52 = arith.constant 0 : index
    %148 = vector.load %arg8[%c0_51, %c0_52] : memref<4x32xf32, #tpu.memory_space<vmem>>, vector<4x32xf32>
    tpu.vector_store %arg8[%c0_51, %c0_52], %125 {strides = array<i32>} : memref<4x32xf32, #tpu.memory_space<vmem>>, vector<4x32xf32>,
    %c0_53 = arith.constant 0 : index
    %c0_54 = arith.constant 0 : index
    %149 = vector.load %arg7[%c0_53, %c0_54] : memref<4x32xf32, #tpu.memory_space<vmem>>, vector<4x32xf32>
    tpu.vector_store %arg7[%c0_53, %c0_54], %125 {strides = array<i32>} : memref<4x32xf32, #tpu.memory_space<vmem>>, vector<4x32xf32>,
    return
  }
  func.func @transform_0(%arg0: i32) -> (i32, i32, i32) {
    %c0_i32 = arith.constant 0 : i32
    %c0_i32_0 = arith.constant 0 : i32
    %c0_i32_1 = arith.constant 0 : i32
    return %arg0, %c0_i32, %c0_i32_0 : i32, i32, i32
  }
  func.func @transform_1(%arg0: i32) -> (i32, i32) {
    %c0_i32 = arith.constant 0 : i32
    %c0_i32_0 = arith.constant 0 : i32
    %c0_i32_1 = arith.constant 0 : i32
    return %c0_i32, %c0_i32_0 : i32, i32
  }
  func.func @transform_2(%arg0: i32) -> (i32, i32, i32) {
    %c0_i32 = arith.constant 0 : i32
    %c0_i32_0 = arith.constant 0 : i32
    %c0_i32_1 = arith.constant 0 : i32
    %c0_i32_2 = arith.constant 0 : i32
    return %c0_i32, %c0_i32_0, %c0_i32_1 : i32, i32, i32
  }
  func.func @transform_3(%arg0: i32) -> (i32, i32) {
    %c0_i32 = arith.constant 0 : i32
    %c0_i32_0 = arith.constant 0 : i32
    %c0_i32_1 = arith.constant 0 : i32
    return %c0_i32, %c0_i32_0 : i32, i32
  }
  func.func @transform_4(%arg0: i32) -> (i32, i32) {
    %c0_i32 = arith.constant 0 : i32
    %c0_i32_0 = arith.constant 0 : i32
    %c0_i32_1 = arith.constant 0 : i32
    return %c0_i32, %c0_i32_0 : i32, i32
  }
  func.func @transform_5(%arg0: i32) -> (i32, i32, i32) {
    %c0_i32 = arith.constant 0 : i32
    %c0_i32_0 = arith.constant 0 : i32
    %c0_i32_1 = arith.constant 0 : i32
    return %arg0, %c0_i32, %c0_i32_0 : i32, i32, i32
  }
  func.func @transform_6(%arg0: i32) -> (i32, i32) {
    %c0_i32 = arith.constant 0 : i32
    %c0_i32_0 = arith.constant 0 : i32
    %c0_i32_1 = arith.constant 0 : i32
    return %c0_i32, %c0_i32_0 : i32, i32
  }
}

</mosaic_0001>

<bundles_post_ra>
// kernel: tpu_custom_call.1
= control target key start
LH: loop header
LB: loop body
LE: loop exit
PB: predicated region body
PF: predicated region fallthrough
CT: control target
= control target key end

     0   :  { %12 = vsyncpa [#allocation4], 0  ;;  %s1261_s0 = inlined_call_operand.hbm [shape: f32[1,4,16], index: 0, kind: input, shape index: {}]   ;;  %s1262_s1 = inlined_call_operand.hbm [shape: f32[4,32], index: 1, kind: input, shape index: {}]   ;;  %s1263_s2 = inlined_call_operand.hbm [shape: f32[8,4,32], index: 2, kind: input, shape index: {}]   ;;  %s1264_s3 = inlined_call_operand.hbm [shape: bf16[272,128], index: 3, kind: input, shape index: {}]   ;;  %s1265_s4 = inlined_call_operand.vmem [shape: f32[8,128], index: 4, kind: input, shape index: {}]   ;;  %s1266_s5 = inlined_call_operand.hbm [shape: f32[1,4,128], index: 5, kind: output, shape index: {0}]   ;;  %s1267_s6 = inlined_call_operand.hbm [shape: f32[4,32], index: 6, kind: output, shape index: {1}]  }
   0x1   :  { %13 = vsyncpa [#allocation7], 0 }
   0x2   :  { %14 = vsyncpa [#allocation10], 0 }
   0x3   :  { %15 = vsyncpa [#allocation5], 0 }
   0x4   :  { %16 = vsyncpa [#allocation13], 0  ;;  %s1052_s21 = smov [#allocation6]   ;;  %s1053_s23 = smov [#allocation3]  }
   0x5   :  { %s33_s22 = sshll.u32 %s1052_s21, 4  ;;  %s23_s24 = sshll.u32 %s1053_s23, 4  ;;  %s34_s22 = int_to_ptr.vmem [resolvable:$true] %s33_s22  ;;  %s24_s24 = int_to_ptr.vmem [resolvable:$true] %s23_s24 }
   0x6   :  { %s910_s27 = scalar_lea.hbm %s1262_s1, 64 }
   0x7   :  { %p911_p0 = scmp.ne.s32.totalorder %s1262_s1, %s910_s27  ;;  %p914_p1 = scmp.lt.u32.totalorder %s910_s27, %s1262_s1 }
   0x9   :  { %p916_p2 = pnand %p914_p1, %p911_p0 }
   0xb   :  { %919 = shalt.err (!%p916_p2)
}
   0xc   :  { %s920_s8 = scalar_lea.vmem %s34_s22, 64  ;;  %p925_p4 = scmp.lt.s32.totalorder %s34_s22, %s34_s22 }
   0xd   :  { %p921_p3 = scmp.ne.s32.totalorder %s34_s22, %s920_s8  ;;  %p926_p5 = scmp.lt.s32.totalorder %s920_s8, %s920_s8 }
   0xf   :  { %p927_p6 = por %p926_p5, %p925_p4 }
  0x11   :  { %p928_p7 = pnand %p927_p6, %p921_p3 }
  0x13   :  { %931 = shalt.err (!%p928_p7)
}
  0x14   :  { %36 = dma.hbm_to_vmem [thread:$0]  %s1262_s1, 64, %s34_s22, [#allocation7]  }
  0x15   :  { %s932_s13 = scalar_lea.hbm %s1261_s0, 64 }
  0x16   :  { %p933_p8 = scmp.ne.s32.totalorder %s1261_s0, %s932_s13  ;;  %p936_p9 = scmp.lt.u32.totalorder %s932_s13, %s1261_s0 }
  0x18   :  { %p938_p10 = pnand %p936_p9, %p933_p8 }
  0x1a   :  { %941 = shalt.err (!%p938_p10)
}
  0x1b   :  { %s942_s18 = scalar_lea.vmem %s24_s24, 64  ;;  %p947_p12 = scmp.lt.s32.totalorder %s24_s24, %s24_s24 }
  0x1c   :  { %p943_p11 = scmp.ne.s32.totalorder %s24_s24, %s942_s18  ;;  %p948_p13 = scmp.lt.s32.totalorder %s942_s18, %s942_s18 }
  0x1e   :  { %p949_p0 = por %p948_p13, %p947_p12 }
  0x20   :  { %p950_p1 = pnand %p949_p0, %p943_p11 }
  0x22   :  { %953 = shalt.err (!%p950_p1)
}
  0x23   :  { %26 = dma.hbm_to_vmem [thread:$0]  %s1261_s0, 64, %s24_s24, [#allocation4]  }
  0x24   :  { %s1054_s20 = smov [#allocation8]   ;;  %s954_s25 = scalar_lea.hbm %s1263_s2, 512 }
  0x25   :  { %s42_s21 = sshll.u32 %s1054_s20, 4  ;;  %p955_p2 = scmp.ne.s32.totalorder %s1263_s2, %s954_s25  ;;  %s43_s21 = int_to_ptr.vmem [resolvable:$true] %s42_s21 }
  0x26   :  { %p958_p3 = scmp.lt.u32.totalorder %s954_s25, %s1263_s2 }
  0x28   :  { %p960_p4 = pnand %p958_p3, %p955_p2 }
  0x2a   :  { %963 = shalt.err (!%p960_p4)
}
  0x2b   :  { %s964_s30 = scalar_lea.vmem %s43_s21, 512  ;;  %p969_p6 = scmp.lt.s32.totalorder %s43_s21, %s43_s21 }
  0x2c   :  { %p965_p5 = scmp.ne.s32.totalorder %s43_s21, %s964_s30  ;;  %p970_p7 = scmp.lt.s32.totalorder %s964_s30, %s964_s30 }
  0x2e   :  { %p971_p8 = por %p970_p7, %p969_p6 }
  0x30   :  { %p972_p9 = pnand %p971_p8, %p965_p5 }
  0x32   :  { %975 = shalt.err (!%p972_p9)
}
  0x33   :  { %s1055_s0 = smov 64   ;;  %s1056_s24 = smov 4  }
  0x34   :  { %48 = dma.hbm_to_vmem [thread:$0]  %s1263_s2, 512, %s43_s21, [#allocation7], %s1055_s0, %s1055_s0, %s1056_s24  }
  0x35   :  { %s1057_s9 = smov [#allocation9]   ;;  %s976_s13 = scalar_lea.hbm %s1264_s3, 2176 }
  0x36   :  { %s54_s10 = sshll.u32 %s1057_s9, 4  ;;  %p977_p10 = scmp.ne.s32.totalorder %s1264_s3, %s976_s13  ;;  %s55_s10 = int_to_ptr.vmem [resolvable:$true] %s54_s10 }
  0x37   :  { %p980_p11 = scmp.lt.u32.totalorder %s976_s13, %s1264_s3 }
  0x39   :  { %p982_p12 = pnand %p980_p11, %p977_p10 }
  0x3b   :  { %985 = shalt.err (!%p982_p12)
}
  0x3c   :  { %s986_s18 = scalar_lea.vmem %s55_s10, 2176  ;;  %p991_p0 = scmp.lt.s32.totalorder %s55_s10, %s55_s10 }
  0x3d   :  { %p987_p13 = scmp.ne.s32.totalorder %s55_s10, %s986_s18  ;;  %p992_p1 = scmp.lt.s32.totalorder %s986_s18, %s986_s18 }
  0x3f   :  { %p993_p2 = por %p992_p1, %p991_p0 }
  0x41   :  { %p994_p3 = pnand %p993_p2, %p987_p13 }
  0x43   :  { %997 = shalt.err (!%p994_p3)
}
  0x44   :  { %60 = dma.hbm_to_vmem [thread:$0]  %s1264_s3, 2176, %s55_s10, [#allocation10], %s1055_s0, %s1055_s0, %s1056_s24  }
  0x45   :  { %1042 = dma.done.wait [#allocation4], 64  }
  0x46   :  { %1043 = vsyncadd [#allocation4], 4294967232 }
  0x47   :  { %1044 = dma.done.wait [#allocation7], 576  }
  0x48   :  { %1045 = vsyncadd [#allocation7], 4294966720 }
  0x49   :  { %1046 = dma.done.wait [#allocation10], 2176  }
  0x4a   :  { %1047 = vsyncadd [#allocation10], 4294965120  ;;  %v1058_v0 = vmov 0.0   ;;  %vm1059_vm0 = vmmov 0   ;;  %v879_v1 = vld [vmem:[#allocation9] sm:$0xff]   ;;  %vm94_vm1 = vcmask 130048   ;;  %v136_v9 = vlaneseq }
  0x4b   :  { %792 = vmatprep.subr.bf16.mxu0 %v1058_v0  ;;  %794 = vmatprep.mubr.msk.f32.mxu0 %vm1059_vm0, %v1058_v0  ;;  %v83_v2 = vld [vmem:[#allocation3] sm:$0xf]  ;;  %v881_v4 = vld [vmem:[#allocation9 + $0x8] sm:$0xff]   ;;  %v80_v5 = vld [vmem:[#allocation6] sm:$0xf]  ;;  %vm81_vm2 = vcmask 257024  }
  0x4c   :  { %797 = vmatprep.subr.bf16.mxu1 %v1058_v0  ;;  %801 = vmatprep.mubr.msk.f32.mxu1 %vm1059_vm0, %v1058_v0  ;;  %v880_v3 = vld [vmem:[#allocation9 + $0x18] sm:$0xff]   ;;  %82 = vst.msk [vmem:[#allocation2] sm:$0xf] %vm81_vm2, %v80_v5  ;;  %v882_v6 = vld [vmem:[#allocation9 + $0x20] sm:$0xff]   ;;  %v883_v7 = vld [vmem:[#allocation9 + $0x10] sm:$0xff]   ;;  %vm162_vm3 = vcmask 261120  }
  0x4d   :  { %793 = vmatpush3.bf16.msra.mxu0 %v879_v1  ;;  %798 = vmatpush3.bf16.msra.mxu1 %v881_v4  ;;  %v1179_v10 = vshrl.u32 %v136_v9, 7  ;;  %v1185_v12 = vld [vmem:[%s1265_s4] sm:$0xff]  ;;  %vm262_vm4 = vcmask 60416   ;;  %v1060_v32 = vmov 2   ;;  %v1061_v33 = vmov 0   ;;  %v886_v45 = vld [vmem:[#allocation9 + $0x38] sm:$0xff]  }
  0x4e   :  { %804 = vmatprep.subr.bf16.mxu0 %v1058_v0  ;;  %799 = vmatprep.subr.bf16.mxu1 %v1058_v0  ;;  %v1062_v37 = vmov 1   ;;  %v1063_v38 = vmov 7   ;;  %v1064_v39 = vmov 3   ;;  %v1065_v40 = vmov 4   ;;  %v884_v43 = vld [vmem:[#allocation9 + $0x28] sm:$0xff]   ;;  %v885_v44 = vld [vmem:[#allocation9 + $0x30] sm:$0xff]  }
  0x4f   :  { %v138_v11 = vsub.s32 0, %v1179_v10  ;;  %v259_v20 = vsub.s32 1, %v1179_v10  ;;  %872 = vset.pattern.permute.xlu0 %v1060_v32  ;;  %870 = vset.pattern.permute.xlu1 %v1061_v33  ;;  %v1066_v41 = vmov 5   ;;  %v1067_v42 = vmov 6   ;;  %v887_v46 = vld [vmem:[#allocation9 + $0x40] sm:$0xff]   ;;  %v889_v9 = vld [vmem:[#allocation9 + $0x70] sm:$0xff]  }
  0x50   :  { %795 = vmatmul.mubr.msk.f32.vlgmr.msra.gmra.mrb[0].mxu0 %vm94_vm1, %v83_v2  ;;  %v282_v49 = vld [vmem:[#allocation8 + $0x4] sm:$0xf]  ;;  %v274_v51 = vld [vmem:[#allocation8] sm:$0xf]  ;;  %v290_v55 = vld [vmem:[#allocation8 + $0x8] sm:$0xf] }
  0x51   :  { %805 = vmatpush3.bf16.msra.mxu0 %v880_v3  ;;  %808 = vmatprep.mubr.msk.f32.mxu0 %vm1059_vm0, %v1058_v0  ;;  %v139_v13 = vrot.slane %v1185_v12, %v138_v11  ;;  %v260_v21 = vrot.slane %v1185_v12, %v259_v20  ;;  %v298_v58 = vld [vmem:[#allocation8 + $0xc] sm:$0xf]  ;;  %v306_v60 = vld [vmem:[#allocation8 + $0x10] sm:$0xf]  ;;  %v314_v1 = vld [vmem:[#allocation8 + $0x14] sm:$0xf] }
  0x52   :  { %806 = vmatprep.subr.bf16.mxu0 %v1058_v0  ;;  %800 = vmatpush3.bf16.msra.mxu1 %v883_v7  ;;  %v888_v3 = vld [vmem:[#allocation9 + $0x68] sm:$0xff]   ;;  %v322_v4 = vld [vmem:[#allocation8 + $0x18] sm:$0xf]  ;;  %s1068_s4 = smov 32   ;;  %vm374_vm5 = vcmask 523264   ;;  %v539_v33 = vsub.s32 5, %v1179_v10 }
  0x53   :  { %v1172_v8 = vld [vmem:[#allocation2] sm:$0xf]  ;;  %811 = vmatprep.subr.bf16.mxu1 %v1058_v0  ;;  %s1069_s20 = smov 96   ;;  %vm691_vm6 = vcmask 1043456   ;;  %s1070_s21 = smov [#allocation12]  }
  0x54   :  { %s726_s22 = sshll.u32 %s1070_s21, 4  ;;  %s727_s22 = int_to_ptr.vmem [resolvable:$true] %s726_s22 }
  0x55   :  { %807 = vmatpush3.bf16.msra.mxu0 %v882_v6  ;;  %s998_s23 = scalar_lea.vmem %s727_s22, 64  ;;  %p1003_p5 = scmp.lt.s32.totalorder %s727_s22, %s727_s22 }
  0x56   :  { %822 = vmatprep.subr.bf16.mxu0 %v1058_v0  ;;  %p999_p4 = scmp.ne.s32.totalorder %s727_s22, %s998_s23  ;;  %p1004_p6 = scmp.lt.s32.totalorder %s998_s23, %s998_s23 }
  0x58   :  { %809 = vmatmul.mubr.msk.f32.vlgmr.msra.gmra.mrb[2].mxu0 %vm162_vm3, %v1172_v8  ;;  %p1005_p7 = por %p1004_p6, %p1003_p5 }
  0x59   :  { %826 = vmatprep.mubr.msk.f32.mxu0 %vm1059_vm0, %v1058_v0  ;;  %823 = vmatpush3.bf16.msra.mxu0 %v888_v3 }
  0x5a   :  { %824 = vmatprep.subr.bf16.mxu0 %v1058_v0  ;;  %p1006_p8 = pnand %p1005_p7, %p999_p4 }
  0x5d   :  { %825 = vmatpush3.bf16.msra.mxu0 %v889_v9 }
  0x5e   :  { %829 = vmatprep.subr.bf16.mxu0 %v1058_v0 }
 0x123   :  { %v132_v14 = vpop.f32.mrb[0].mxu0 }
 0x124   :  { %v1188_v15 = vadd.f32 %v139_v13, %v132_v14  ;;  %v796_v16 = vpop.f32.mrb[1].mxu0  ;;  %v330_v14 = vld [vmem:[#allocation8 + $0x1c] sm:$0xf] }
 0x126   :  { %v141_v17 = vmax.f32 %v1188_v15, 0.0  ;;  %v892_v15 = vld [vmem:[#allocation9 + $0x58] sm:$0xff]  }
 0x128   :  { %802 = vmatmul.mubr.msk.f32.vlgmr.msra.gmra.mrb[0].mxu1 %vm162_vm3, %v141_v17 }
 0x129   :  { %819 = vmatprep.mubr.msk.f32.mxu1 %vm1059_vm0, %v1058_v0  ;;  %812 = vmatpush3.bf16.msra.mxu1 %v884_v43 }
 0x12a   :  { %813 = vmatprep.subr.bf16.mxu1 %v1058_v0 }
 0x12b   :  { %v253_v18 = vpop.f32.mrb[2].mxu0 }
 0x12c   :  { %v810_v19 = vpop.f32.mrb[3].mxu0 }
 0x12d   :  { %814 = vmatpush3.bf16.msra.mxu1 %v885_v44 }
 0x12e   :  { %815 = vmatprep.subr.bf16.mxu1 %v1058_v0 }
 0x131   :  { %816 = vmatpush3.bf16.msra.mxu1 %v886_v45 }
 0x132   :  { %817 = vmatprep.subr.bf16.mxu1 %v1058_v0 }
 0x135   :  { %818 = vmatpush3.bf16.msra.mxu1 %v887_v46 }
 0x136   :  { %836 = vmatprep.subr.bf16.mxu1 %v1058_v0 }
 0x1fb   :  { %v200_v22 = vpop.f32.mrb[0].mxu1 }
 0x1fc   :  { %v254_v23 = vadd.f32 %v253_v18, %v200_v22  ;;  %v803_v24 = vpop.f32.mrb[1].mxu1 }
 0x1fd   :  { %v418_v24 = vsub.s32 2, %v1179_v10 }
 0x1fe   :  { %v261_v25 = vadd.f32 %v260_v21, %v254_v23 }
 0x200   :  { %v263_v26 = vsel %vm262_vm4, %v261_v25, -inf }
 0x201   :  { %264 = vmax.xlane.f32.xlu0 %v263_v26 }
 0x28e   :  { %v265_v27 = vpop.xlane.xlu0 %264 }
 0x28f   :  { %v266_v28 = vsub.f32 %v261_v25, %v265_v27  ;;  %v419_v25 = vrot.slane %v1185_v12, %v418_v24  ;;  %v890_v27 = vld [vmem:[#allocation9 + $0x78] sm:$0xff]  }
 0x291   :  { %v267_v29 = vmul.f32 1.442695, %v266_v28 }
 0x293   :  { %896 = vpow2.f32 %v267_v29 }
 0x29d   :  { %v897_v30 = vpop.eup %896 }
 0x29e   :  { %v269_v31 = vsel %vm262_vm4, %v897_v30, 0.0 }
 0x29f   :  { %270 = vadd.xlane.f32.xlu0 %v269_v31 }
 0x32c   :  { %v271_v34 = vpop.xlane.xlu0 %270 }
 0x32d   :  { %898 = vrcp.f32 %v271_v34  ;;  %v540_v34 = vrot.slane %v1185_v12, %v539_v33 }
 0x337   :  { %v899_v35 = vpop.eup %898 }
 0x338   :  { %v273_v36 = vmul.f32 %v899_v35, %v897_v30  ;;  %v891_v30 = vld [vmem:[#allocation9 + $0x80] sm:$0xff]  }
 0x33a   :  { %292 = vperm.xlu0 %872, %v273_v36   ;;  %277 = vperm.xlu1 %870, %v273_v36  }
 0x33e   :  { %871 = vset.pattern.permute.xlu1 %v1062_v37  ;;  %878 = vset.pattern.permute.xlu0 %v1063_v38 }
 0x33f   :  { %284 = vperm.xlu1 %871, %v273_v36  }
 0x343   :  { %873 = vset.pattern.permute.xlu1 %v1064_v39 }
 0x344   :  { %300 = vperm.xlu1 %873, %v273_v36  }
 0x348   :  { %874 = vset.pattern.permute.xlu1 %v1065_v40  ;;  %v480_v40 = vsub.s32 4, %v1179_v10 }
 0x349   :  { %308 = vperm.xlu1 %874, %v273_v36  }
 0x34d   :  { %875 = vset.pattern.permute.xlu1 %v1066_v41  ;;  %v481_v41 = vrot.slane %v1185_v12, %v480_v40 }
 0x34e   :  { %316 = vperm.xlu1 %875, %v273_v36  }
 0x352   :  { %876 = vset.pattern.permute.xlu1 %v1067_v42 }
 0x353   :  { %324 = vperm.xlu1 %876, %v273_v36  }
 0x357   :  { %877 = vset.pattern.permute.xlu1 %v1063_v38 }
 0x358   :  { %332 = vperm.xlu1 %877, %v273_v36  }
 0x3b9   :  { %v278_v47 = vpop.permute.xlu1 %277  ;;  %v293_v56 = vpop.permute.xlu0 %292 }
 0x3ba   :  { %v280_v53 = vmul.f32 %v278_v47, %v274_v51  ;;  %v295_v59 = vmul.f32 %v293_v56, %v290_v55 }
 0x3be   :  { %v285_v48 = vpop.permute.xlu1 %284 }
 0x3bf   :  { %v287_v52 = vmul.f32 %v285_v48, %v282_v49 }
 0x3c1   :  { %v288_v57 = vadd.f32 %v287_v52, %v280_v53  ;;  %v894_v52 = vld [vmem:[#allocation9 + $0x48] sm:$0xff]   ;;  %v895_v53 = vld [vmem:[#allocation9 + $0x50] sm:$0xff]  }
 0x3c3   :  { %v301_v50 = vpop.permute.xlu1 %300  ;;  %v296_v62 = vadd.f32 %v295_v59, %v288_v57 }
 0x3c4   :  { %v303_v63 = vmul.f32 %v301_v50, %v298_v58 }
 0x3c6   :  { %v304_v5 = vadd.f32 %v303_v63, %v296_v62 }
 0x3c8   :  { %v309_v54 = vpop.permute.xlu1 %308 }
 0x3c9   :  { %v311_v2 = vmul.f32 %v309_v54, %v306_v60 }
 0x3cb   :  { %v312_v11 = vadd.f32 %v311_v2, %v304_v5 }
 0x3cd   :  { %v317_v61 = vpop.permute.xlu1 %316 }
 0x3ce   :  { %v319_v6 = vmul.f32 %v317_v61, %v314_v1 }
 0x3d0   :  { %v320_v16 = vadd.f32 %v319_v6, %v312_v11 }
 0x3d2   :  { %v325_v7 = vpop.permute.xlu1 %324 }
 0x3d3   :  { %v327_v13 = vmul.f32 %v325_v7, %v322_v4 }
 0x3d5   :  { %v328_v19 = vadd.f32 %v327_v13, %v320_v16 }
 0x3d7   :  { %v333_v18 = vpop.permute.xlu1 %332 }
 0x3d8   :  { %v335_v20 = vmul.f32 %v333_v18, %v330_v14 }
 0x3da   :  { %v336_v21 = vadd.f32 %v335_v20, %v328_v19 }
 0x3dc   :  { %338 = vrot.lane.b32.xlu1 %v336_v21, %s1068_s4 }
 0x44e   :  { %v339_v22 = vpop.permute.xlu1 %338 }
 0x44f   :  { %v341_v23 = vsel %vm162_vm3, %v141_v17, %v339_v22  ;;  %v893_v17 = vld [vmem:[#allocation9 + $0x60] sm:$0xff]  }
 0x450   :  { %820 = vmatmul.mubr.msk.f32.vlgmr.msra.gmra.mrb[2].mxu1 %vm374_vm5, %v341_v23 }
 0x451   :  { %840 = vmatprep.mubr.msk.f32.mxu1 %vm1059_vm0, %v1058_v0  ;;  %837 = vmatpush3.bf16.msra.mxu1 %v894_v52 }
 0x452   :  { %838 = vmatprep.subr.bf16.mxu1 %v1058_v0 }
 0x455   :  { %839 = vmatpush3.bf16.msra.mxu1 %v895_v53 }
 0x523   :  { %v412_v26 = vpop.f32.mrb[2].mxu1 }
 0x524   :  { %v420_v28 = vadd.f32 %v419_v25, %v412_v26  ;;  %v821_v29 = vpop.f32.mrb[3].mxu1 }
 0x526   :  { %827 = vmatmul.mubr.msk.f32.vlgmr.msra.gmra.mrb[4].mxu0 %vm162_vm3, %v420_v28 }
 0x527   :  { %830 = vmatpush3.bf16.msra.mxu0 %v890_v27  ;;  %833 = vmatprep.mubr.msk.f32.mxu0 %vm1059_vm0, %v1058_v0 }
 0x528   :  { %831 = vmatprep.subr.bf16.mxu0 %v1058_v0 }
 0x52b   :  { %832 = vmatpush3.bf16.msra.mxu0 %v891_v30 }
 0x52c   :  { %843 = vmatprep.subr.bf16.mxu0 %v1058_v0 }
 0x52e   :  { %834 = vmatmul.mubr.msk.f32.vlgmr.msra.gmra.mrb[6].mxu0 %vm162_vm3, %v1172_v8 }
 0x52f   :  { %844 = vmatpush3.bf16.msra.mxu0 %v892_v15  ;;  %847 = vmatprep.mubr.msk.f32.mxu0 %vm1059_vm0, %v1058_v0 }
 0x530   :  { %845 = vmatprep.subr.bf16.mxu0 %v1058_v0  ;;  %v688_v0 = vsub.s32 3, %v1179_v10 }
 0x532   :  { %v689_v62 = vrot.slane %v1185_v12, %v688_v0 }
 0x533   :  { %846 = vmatpush3.bf16.msra.mxu0 %v893_v17 }
 0x536   :  { %848 = vmatmul.mubr.msk.f32.vlgmr.msra.gmra.mrb[8].mxu0 %vm162_vm3, %v336_v21 }
 0x5f9   :  { %v474_v31 = vpop.f32.mrb[4].mxu0 }
 0x5fa   :  { %v828_v32 = vpop.f32.mrb[5].mxu0  ;;  %v482_v42 = vadd.f32 %v481_v41, %v474_v31 }
 0x601   :  { %v533_v35 = vpop.f32.mrb[6].mxu0 }
 0x602   :  { %v541_v36 = vadd.f32 %v540_v34, %v533_v35  ;;  %v835_v37 = vpop.f32.mrb[7].mxu0 }
 0x604   :  { %550 = vrot.lane.b32.xlu1 %v541_v36, %s1055_s0  ;;  %v542_v43 = vadd.f32 %v541_v36, %v482_v42 }
 0x606   :  { %v760_v44 = vmul.f32 -1.442695, %v542_v43 }
 0x608   :  { %900 = vpow2.f32 %v760_v44 }
 0x609   :  { %v682_v38 = vpop.f32.mrb[8].mxu0 }
 0x60a   :  { %v849_v39 = vpop.f32.mrb[9].mxu0 }
 0x612   :  { %v901_v45 = vpop.eup %900 }
 0x613   :  { %v546_v46 = vadd.f32 1.0, %v901_v45 }
 0x615   :  { %902 = vrcp.f32 %v546_v46 }
 0x61f   :  { %v903_v47 = vpop.eup %902 }
 0x620   :  { %v560_v56 = vsub.f32 1.0, %v903_v47 }
 0x676   :  { %v551_v48 = vpop.permute.xlu1 %550 }
 0x677   :  { %v553_v49 = vmul.f32 %v903_v47, %v551_v48 }
 0x679   :  { %555 = vrot.lane.b32.xlu1 %v553_v49, %s1055_s0 }
 0x6eb   :  { %v556_v50 = vpop.permute.xlu1 %555 }
 0x6ec   :  { %v558_v51 = vadd.f32 %v556_v50, %v482_v42 }
 0x6ee   :  { %904 = vtanh.f32 %v558_v51 }
 0x6f8   :  { %v905_v54 = vpop.eup %904 }
 0x6f9   :  { %562 = vrot.lane.b32.xlu1 %v905_v54, %s1069_s20 }
 0x6fd   :  { %566 = vrot.lane.b32.xlu1 %v1172_v8, %s1068_s4 }
 0x76b   :  { %v563_v55 = vpop.permute.xlu1 %562 }
 0x76c   :  { %v565_v58 = vmul.f32 %v563_v55, %v560_v56 }
 0x76f   :  { %v567_v57 = vpop.permute.xlu1 %566 }
 0x770   :  { %v569_v59 = vmul.f32 %v903_v47, %v567_v57 }
 0x772   :  { %v570_v60 = vadd.f32 %v569_v59, %v565_v58 }
 0x774   :  { %580 = vrot.lane.b32.xlu1 %v570_v60, %s1069_s20 }
 0x7e6   :  { %v581_v61 = vpop.permute.xlu1 %580 }
 0x7e7   :  { %708 = vst.msk [vmem:[#allocation2] sm:$0xf] %vm81_vm2, %v581_v61  ;;  %709 = vst.msk [vmem:[#allocation12] sm:$0xf] %vm81_vm2, %v581_v61  ;;  %841 = vmatmul.mubr.msk.f32.vlgmr.msra.gmra.mrb[4].mxu1 %vm162_vm3, %v581_v61 }
 0x8ba   :  { %v630_v63 = vpop.f32.mrb[4].mxu1 }
 0x8bb   :  { %v683_v8 = vadd.f32 %v682_v38, %v630_v63  ;;  %v842_v1 = vpop.f32.mrb[5].mxu1 }
 0x8bd   :  { %v690_v2 = vadd.f32 %v689_v62, %v683_v8 }
 0x8bf   :  { %v692_v3 = vsel %vm691_vm6, %v690_v2, -inf }
 0x8c0   :  { %693 = vmax.xlane.f32.xlu0 %v692_v3 }
 0x94d   :  { %v694_v4 = vpop.xlane.xlu0 %693 }
 0x94e   :  { %v695_v5 = vsub.f32 %v690_v2, %v694_v4 }
 0x950   :  { %v696_v6 = vmul.f32 1.442695, %v695_v5 }
 0x952   :  { %906 = vpow2.f32 %v696_v6 }
 0x95c   :  { %v907_v7 = vpop.eup %906 }
 0x95d   :  { %v698_v9 = vsel %vm691_vm6, %v907_v7, 0.0 }
 0x95e   :  { %699 = vadd.xlane.f32.xlu1 %v698_v9 }
 0x95f   :  { %1009 = shalt.err (!%p1006_p8)
}
 0x960   :  { %s1010_s27 = scalar_lea.hbm %s1267_s6, 64 }
 0x961   :  { %p1011_p9 = scmp.ne.s32.totalorder %s1267_s6, %s1010_s27  ;;  %p1014_p10 = scmp.lt.u32.totalorder %s1010_s27, %s1267_s6 }
 0x963   :  { %p1016_p11 = pnand %p1014_p10, %p1011_p9 }
 0x965   :  { %1019 = shalt.err (!%p1016_p11)
}
 0x966   :  { %729 = dma.vmem_to_hbm [thread:$0]  %s727_s22, 64, %s1267_s6, [#allocation13]  }
 0x967   :  { %s1071_s8 = smov [#allocation11]  }
 0x968   :  { %s716_s9 = sshll.u32 %s1071_s8, 4  ;;  %s717_s9 = int_to_ptr.vmem [resolvable:$true] %s716_s9 }
 0x969   :  { %s1020_s10 = scalar_lea.vmem %s717_s9, 64  ;;  %p1025_p13 = scmp.lt.s32.totalorder %s717_s9, %s717_s9 }
 0x96a   :  { %p1021_p12 = scmp.ne.s32.totalorder %s717_s9, %s1020_s10  ;;  %p1026_p0 = scmp.lt.s32.totalorder %s1020_s10, %s1020_s10 }
 0x96c   :  { %p1027_p1 = por %p1026_p0, %p1025_p13 }
 0x96e   :  { %p1028_p2 = pnand %p1027_p1, %p1021_p12 }
 0x9eb   :  { %v700_v10 = vpop.xlane.xlu1 %699 }
 0x9ec   :  { %908 = vlog2.f32 %v700_v10 }
 0x9f6   :  { %v909_v12 = vpop.eup %908 }
 0x9f7   :  { %v702_v11 = vmul.f32 0.6931472, %v909_v12 }
 0x9f9   :  { %v703_v13 = vadd.f32 %v702_v11, %v694_v4 }
 0x9fb   :  { %v704_v14 = vsub.f32 %v690_v2, %v703_v13 }
 0x9fd   :  { %705 = vst [vmem:[#allocation11] sm:$0xf] %v704_v14 }
 0x9fe   :  { %1031 = shalt.err (!%p1028_p2)
}
 0x9ff   :  { %s1032_s6 = scalar_lea.hbm %s1266_s5, 64 }
 0xa00   :  { %p1033_p3 = scmp.ne.s32.totalorder %s1266_s5, %s1032_s6  ;;  %p1036_p4 = scmp.lt.u32.totalorder %s1032_s6, %s1266_s5 }
 0xa02   :  { %p1038_p5 = pnand %p1036_p4, %p1033_p3 }
 0xa04   :  { %1041 = shalt.err (!%p1038_p5)
}
 0xa05   :  { %719 = dma.vmem_to_hbm [thread:$0]  %s717_s9, 64, %s1266_s5, [#allocation5]  }
 0xa06   :  { %1048 = dma.done.wait [#allocation5], 64  }
 0xa07   :  { %1049 = vsyncadd [#allocation5], 4294967232 }
 0xa08   :  { %1050 = dma.done.wait [#allocation13], 64  }
 0xa09   :  { %1051 = vsyncadd [#allocation13], 4294967232 }
 0xa0a   :  { %736 = vsyncpa [#allocation4], 1 }
 0xa0b   :  { %737 = vsyncpa [#allocation7], 1 }
 0xa0c   :  { %738 = vsyncpa [#allocation10], 1 }
 0xa0d   :  { %739 = vsyncpa [#allocation5], 1 }
 0xa0e   :  { %740 = vsyncpa [#allocation13], 1 }

</bundles_post_ra>
